<compile_context>
chip_gen: v7x
topology: tpu7x:2x2x1
jax: 0.10.0
libtpu: 0.0.40
codegen_flags: <defaults>
</compile_context>

<pallas_src>
import numpy as np
import jax
import jax.numpy as jnp
from jax.experimental import pallas as pl
from jax.experimental.pallas import tpu as pltpu


# ----------------------------- Pallas kernel ------------------------------- #

def _scale_kernel(v_ref, g_ref, o_ref):
    # out = agent_distance_exp * v   (grid row broadcast over the batch tile)
    o_ref[...] = v_ref[...] * g_ref[...]


def _pick_tile_b(B, F, dtype_bytes=4, vmem_budget_bytes=16 * 1024 * 1024):
    """Largest batch tile whose double-buffered in+out stays under the budget.

    Budget is sized against the tightest chip (v7x: 64 MiB physical VMEM,
    32 MiB default scoped); 16 MiB leaves headroom for the (1, F) grid block
    and compiler scratch, so no vmem_limit override is needed on any chip.
    """
    if B <= 8:
        return B                       # single block covers the whole array
    max_rows = vmem_budget_bytes // (4 * F * dtype_bytes)   # 2x-buffered in + out
    tile = min(B, max_rows, 4096)
    return max(8, (tile // 8) * 8)     # keep the (8, 128) sublane constraint


def cnn_agent_scale_flatten(v_net, dist_grid):
    """flatten(agent_distance_exp * net(input), start_dim=-3) as a Pallas kernel.

    v_net:     (B, 1, H, W) float32 — output of self.net (see TODO below)
    dist_grid: (H, W)       float32 — dist_grid(input_shape[1])['0']
    returns:   (B, H*W)     float32
    """
    if v_net.ndim == 3:                # matches `input.unsqueeze(0)` in forward()
        v_net = v_net[None]
    B, C, H, W = v_net.shape
    assert C == 1, "Comms not supported (n_out_channels must be 1)"
    F = C * H * W                      # == n_actions
    v2d = v_net.reshape(B, F)          # flatten(start_dim=-3), fused with the scale
    g2d = dist_grid.astype(v_net.dtype).reshape(1, F)

    tile_b = _pick_tile_b(B, F, dtype_bytes=v2d.dtype.itemsize)
    grid = (pl.cdiv(B, tile_b),)

    return pl.pallas_call(
        _scale_kernel,
        out_shape=jax.ShapeDtypeStruct((B, F), v2d.dtype),
        grid=grid,
        in_specs=[
            pl.BlockSpec((tile_b, F), lambda i: (i, 0)),
            pl.BlockSpec((1, F), lambda i: (0, 0)),      # distance grid, resident
        ],
        out_specs=pl.BlockSpec((tile_b, F), lambda i: (i, 0)),
        compiler_params=pltpu.CompilerParams(
            dimension_semantics=("parallel",),           # megacore split on v7x
        ),
    )(v2d, g2d)


# -------------------------- wrapper (exact semantics) ----------------------- #

def dist_grid_center(h, gamma=0.5):
    """Exact numpy replication of CNNAgent.dist_grid(sz=h, gamma)['0']."""
    assert h % 2 == 1, "Only odd grid sizes supported when converting to action"
    sz = h + 2
    small_sz = int(np.ceil(sz / 2))
    small = np.full((small_sz, small_sz), small_sz - 1)
    for i in range(small_sz - 2, -1, -1):
        small[: i + 1, : i + 1] = i
    large = np.block([
        [np.flip(small[1:, 1:]), np.flipud(small[1:, :])],
        [np.fliplr(small[:, 1:]), small],
    ])
    c_grid = gamma ** large[1:-1, 1:-1]
    return jnp.asarray(c_grid, dtype=jnp.float32)


def cnn_agent_forward(v_net, dist_grid, n_agents, env_info=None):
    """CNNAgent.forward for the default env_info=None path.

    # TODO(synk): self.net (net_from_string(args.agent_arch)) is not specified
    # in the reference; the kernel consumes the net output `v_net` directly.
    """
    v = cnn_agent_scale_flatten(v_net, dist_grid)        # (L, n_actions)
    L = v.shape[0]
    bs = L // n_agents

    # target_update(): with env_info=None every worker takes the
    # `target_update[i, :, 0] = 0; continue` branch and v is left untouched.
    target_update = jnp.ones((bs, n_agents, 2), dtype=jnp.uint8)
    target_update = target_update.at[:, :, 0].set(0)
    target_update = target_update.reshape(L, 2)
    # TODO(synk): the env_info != None branch (target_update_policy: python dict
    # walking + np.random re-evaluation per agent) is host-side control flow
    # with no Pallas equivalent.

    # _flatten_env_info() with env_info=None -> all agents marked -1.
    env_info_out = {"act_info": [[-1] * n_agents for _ in range(bs)]}

    return v, jnp.zeros((1,), dtype=jnp.float32), target_update, env_info_out


# ----------------------------------- demo ----------------------------------- #

if __name__ == "__main__":
    key = jax.random.PRNGKey(0)
    bs, n_agents = 2, 4
    H = W = 7                          # odd observation grid
    n_actions = H * W                  # n_out_channels == n_actions/(H*W) == 1
    B = bs * n_agents

    # Stand-in for self.net(input): (B, n_out_channels=1, H, W).
    v_net = jax.random.normal(key, (B, 1, H, W), dtype=jnp.float32)
    grid0 = dist_grid_center(H, gamma=0.5)   # args.agent_distance_exp = 0.5

    v, zero, target_update, env_info = cnn_agent_forward(
        v_net, grid0, n_agents, env_info=None)
    v = jax.block_until_ready(v)

    # Reference: agent_distance_exp * net_out, flattened from dim -3.
    ref = (grid0[None, None] * v_net).reshape(B, n_actions)
    assert v.shape == (B, n_actions) and v.dtype == jnp.float32
    assert bool(jnp.allclose(v, ref, rtol=1e-6, atol=1e-6))
    assert target_update.shape == (B, 2) and target_update.dtype == jnp.uint8
    assert bool(jnp.all(target_update[:, 0] == 0))
    assert bool(jnp.all(target_update[:, 1] == 1))
    assert zero.shape == (1,) and float(zero[0]) == 0.0
    assert env_info == {"act_info": [[-1] * n_agents for _ in range(bs)]}
    print("KERNEL_OK")
</pallas_src>

<mosaic_0001>
module attributes {stable_mosaic.version = 11 : i64} {
  func.func @_scale_kernel(%arg0: i32, %arg1: memref<8x49xf32, #tpu.memory_space<vmem>>, %arg2: memref<1x49xf32, #tpu.memory_space<vmem>>, %arg3: memref<8x49xf32, #tpu.memory_space<vmem>>) attributes {dimension_semantics = [#tpu.dimension_semantics<parallel>], iteration_bounds = array<i64: 1>, scalar_prefetch = 0 : i64, scratch_operands = 0 : i64, tpu.core_type = #tpu.core_type<tc>, window_params = [{transform_indices = @transform_0, window_bounds = array<i64: 8, 49>}, {pipeline_mode = #tpu.pipeline_mode<synchronous>, transform_indices = @transform_1, window_bounds = array<i64: 1, 49>}, {transform_indices = @transform_2, window_bounds = array<i64: 8, 49>}]} {
    %c0 = arith.constant 0 : index
    %c0_0 = arith.constant 0 : index
    %0 = vector.load %arg1[%c0, %c0_0] : memref<8x49xf32, #tpu.memory_space<vmem>>, vector<8x49xf32>
    %c0_1 = arith.constant 0 : index
    %c0_2 = arith.constant 0 : index
    %1 = vector.load %arg2[%c0_1, %c0_2] : memref<1x49xf32, #tpu.memory_space<vmem>>, vector<1x49xf32>
    %2 = vector.broadcast %1 : vector<1x49xf32> to vector<8x49xf32>
    %3 = arith.mulf %0, %2 : vector<8x49xf32>
    %c0_3 = arith.constant 0 : index
    %c0_4 = arith.constant 0 : index
    %4 = vector.load %arg3[%c0_3, %c0_4] : memref<8x49xf32, #tpu.memory_space<vmem>>, vector<8x49xf32>
    tpu.vector_store %arg3[%c0_3, %c0_4], %3 {strides = array<i32>} : memref<8x49xf32, #tpu.memory_space<vmem>>, vector<8x49xf32>,
    return
  }
  func.func @transform_0(%arg0: i32) -> (i32, i32) {
    %c0_i32 = arith.constant 0 : i32
    %c0_i32_0 = arith.constant 0 : i32
    return %arg0, %c0_i32 : i32, i32
  }
  func.func @transform_1(%arg0: i32) -> (i32, i32) {
    %c0_i32 = arith.constant 0 : i32
    %c0_i32_0 = arith.constant 0 : i32
    %c0_i32_1 = arith.constant 0 : i32
    return %c0_i32, %c0_i32_0 : i32, i32
  }
  func.func @transform_2(%arg0: i32) -> (i32, i32) {
    %c0_i32 = arith.constant 0 : i32
    %c0_i32_0 = arith.constant 0 : i32
    return %arg0, %c0_i32 : i32, i32
  }
}

</mosaic_0001>

<bundles_post_ra>
// kernel: tpu_custom_call.1
= control target key start
LH: loop header
LB: loop body
LE: loop exit
PB: predicated region body
PF: predicated region fallthrough
CT: control target
= control target key end

     0   :  { %7 = vsyncpa [#allocation3], 0  ;;  %s145_s0 = inlined_call_operand.hbm [shape: f32[8,49], index: 0, kind: input, shape index: {}]   ;;  %s146_s1 = inlined_call_operand.vmem [shape: f32[1,49], index: 1, kind: input, shape index: {}]   ;;  %s147_s2 = inlined_call_operand.hbm [shape: f32[8,49], index: 2, kind: output, shape index: {}]  }
   0x1   :  { %8 = vsyncpa [#allocation4], 0  ;;  %s101_s9 = smov [#allocation2]   ;;  %s53_s13 = scalar_lea.hbm %s145_s0, 128 }
   0x2   :  { %s15_s10 = sshll.u32 %s101_s9, 4  ;;  %p54_p0 = scmp.ne.s32.totalorder %s145_s0, %s53_s13  ;;  %s16_s10 = int_to_ptr.vmem [resolvable:$true] %s15_s10 }
   0x3   :  { %p57_p1 = scmp.lt.u32.totalorder %s53_s13, %s145_s0 }
   0x5   :  { %p59_p2 = pnand %p57_p1, %p54_p0 }
   0x7   :  { %62 = shalt.err (!%p59_p2)
}
   0x8   :  { %s63_s18 = scalar_lea.vmem %s16_s10, 128  ;;  %p68_p4 = scmp.lt.s32.totalorder %s16_s10, %s16_s10 }
   0x9   :  { %p64_p3 = scmp.ne.s32.totalorder %s16_s10, %s63_s18  ;;  %p69_p5 = scmp.lt.s32.totalorder %s63_s18, %s63_s18 }
   0xb   :  { %p70_p6 = por %p69_p5, %p68_p4 }
   0xd   :  { %p71_p7 = pnand %p70_p6, %p64_p3 }
   0xf   :  { %74 = shalt.err (!%p71_p7)
}
  0x10   :  { %18 = dma.hbm_to_vmem [thread:$0]  %s145_s0, 128, %s16_s10, [#allocation3]  }
  0x11   :  { %97 = dma.done.wait [#allocation3], 128  }
  0x12   :  { %98 = vsyncadd [#allocation3], 4294967168  ;;  %s102_s21 = smov [#allocation5]   ;;  %v24_v0 = vld [vmem:[#allocation2] sm:$0xff]  ;;  %vm33_vm0 = vcmask 400384  }
  0x13   :  { %s41_s22 = sshll.u32 %s102_s21, 4  ;;  %v50_v1 = vld [vmem:[%s146_s1] ss:$0 sm:$0xff]  ;;  %s42_s22 = int_to_ptr.vmem [resolvable:$true] %s41_s22 }
  0x14   :  { %v32_v2 = vmul.f32 %v50_v1, %v24_v0  ;;  %s75_s25 = scalar_lea.vmem %s42_s22, 128  ;;  %p80_p9 = scmp.lt.s32.totalorder %s42_s22, %s42_s22 }
  0x15   :  { %p76_p8 = scmp.ne.s32.totalorder %s42_s22, %s75_s25  ;;  %p81_p10 = scmp.lt.s32.totalorder %s75_s25, %s75_s25 }
  0x16   :  { %34 = vst.msk [vmem:[#allocation5] sm:$0xff] %vm33_vm0, %v32_v2 }
  0x17   :  { %p82_p11 = por %p81_p10, %p80_p9 }
  0x19   :  { %p83_p12 = pnand %p82_p11, %p76_p8 }
  0x1b   :  { %86 = shalt.err (!%p83_p12)
}
  0x1c   :  { %s87_s27 = scalar_lea.hbm %s147_s2, 128 }
  0x1d   :  { %p88_p13 = scmp.ne.s32.totalorder %s147_s2, %s87_s27  ;;  %p91_p0 = scmp.lt.u32.totalorder %s87_s27, %s147_s2 }
  0x1f   :  { %p93_p1 = pnand %p91_p0, %p88_p13 }
  0x21   :  { %96 = shalt.err (!%p93_p1)
}
  0x22   :  { %44 = dma.vmem_to_hbm [thread:$0]  %s42_s22, 128, %s147_s2, [#allocation4]  }
  0x23   :  { %99 = dma.done.wait [#allocation4], 128  }
  0x24   :  { %100 = vsyncadd [#allocation4], 4294967168 }
  0x25   :  { %48 = vsyncpa [#allocation3], 1 }
  0x26   :  { %49 = vsyncpa [#allocation4], 1 }

</bundles_post_ra>
